<compile_context>
chip_gen: v6e
topology: v6e:2x2x1
jax: 0.10.0
libtpu: 0.0.40
codegen_flags: <defaults>
</compile_context>

<pallas_src>
import functools

import jax
import jax.numpy as jnp
from jax.experimental import pallas as pl
from jax.experimental.pallas import tpu as pltpu

_LANE = 128


def _round_up(n, m):
    return (n + m - 1) // m * m


def _cdiv(a, b):
    return -(-a // b)


def _vmem_physical_bytes():
    """Physical per-core VMEM; conservative fallback (v7x) if the query fails."""
    try:
        info = pltpu.get_tpu_info()
        for name in ("vmem_capacity_bytes", "vmem_bytes", "vmem_size_bytes"):
            v = getattr(info, name, None)
            if isinstance(v, int) and v > 0:
                return int(v)
    except Exception:
        pass
    return 64 * 1024 * 1024


# --------------------------------------------------------------------------
# Fused single-pass kernel: pool + shared MLP + apply, TB images per step.
# Block covers the full (C, HW) extent of each image -> no padding, no masks.
# --------------------------------------------------------------------------
def _fused_kernel(x_ref, w1t_ref, b1_ref, w2t_ref, b2_ref, o_ref, *, inv_hw):
    x = x_ref[...]                                            # (tb, C, HW), input dtype
    tb = x.shape[0]
    avg = jnp.sum(x, axis=-1, dtype=jnp.float32) * inv_hw     # (tb, C) f32 accumulation
    mx = jnp.max(x, axis=-1).astype(jnp.float32)              # (tb, C)

    # Shared MLP on avg & max stacked into one matrix -> 2 dots instead of 4.
    stacked = jnp.concatenate([avg, mx], axis=0)              # (2*tb, C)
    h = jnp.maximum(
        jnp.dot(stacked, w1t_ref[...], preferred_element_type=jnp.float32)
        + b1_ref[...], 0.0)                                   # (2*tb, Ch)
    out = (jnp.dot(h, w2t_ref[...], preferred_element_type=jnp.float32)
           + b2_ref[...])                                     # (2*tb, C)
    att = jax.nn.sigmoid(out[:tb] + out[tb:])                 # (tb, C)

    # Apply in the input dtype (no full-tile f32 copy of x).
    o_ref[...] = x * att[:, :, None].astype(o_ref.dtype)


# --------------------------------------------------------------------------
# Two-phase path kernels (large feature maps): pool+MLP, then tiled apply.
# --------------------------------------------------------------------------
def _pool_mlp_kernel(x_ref, w1t_ref, b1_ref, w2t_ref, b2_ref, att_ref,
                     sum_acc, max_acc, *, inv_hw, rem, n_t):
    # rem is None when the last tile is full; otherwise the number of valid
    # lanes in the last tile (OOB lanes of a partial block are UNDEFINED, so
    # both sum and max must be masked there -- but only there).
    t = pl.program_id(1)

    @pl.when(t == 0)
    def _():
        sum_acc[...] = jnp.zeros_like(sum_acc)
        max_acc[...] = jnp.full_like(max_acc, -jnp.inf)

    x = x_ref[...]                                            # (1, C, tile)

    if rem is None:
        sum_acc[...] += jnp.sum(x, axis=-1, dtype=jnp.float32)
        max_acc[...] = jnp.maximum(max_acc[...],
                                   jnp.max(x, axis=-1).astype(jnp.float32))
    else:
        @pl.when(t < n_t - 1)
        def _():                                              # full tiles: no masking
            sum_acc[...] += jnp.sum(x, axis=-1, dtype=jnp.float32)
            max_acc[...] = jnp.maximum(max_acc[...],
                                       jnp.max(x, axis=-1).astype(jnp.float32))

        @pl.when(t == n_t - 1)
        def _():                                              # partial tile: mask tail
            lane = jax.lax.broadcasted_iota(jnp.int32, x.shape, 2)
            valid = lane < rem
            xs = jnp.where(valid, x, 0)
            xm = jnp.where(valid, x, -jnp.inf)
            sum_acc[...] += jnp.sum(xs, axis=-1, dtype=jnp.float32)
            max_acc[...] = jnp.maximum(max_acc[...],
                                       jnp.max(xm, axis=-1).astype(jnp.float32))

    @pl.when(t == n_t - 1)
    def _():
        avg = sum_acc[...] * inv_hw                           # (1, C)
        stacked = jnp.concatenate([avg, max_acc[...]], axis=0)   # (2, C)
        h = jnp.maximum(
            jnp.dot(stacked, w1t_ref[...], preferred_element_type=jnp.float32)
            + b1_ref[...], 0.0)
        out = (jnp.dot(h, w2t_ref[...], preferred_element_type=jnp.float32)
               + b2_ref[...])
        att = jax.nn.sigmoid(out[0:1] + out[1:2])             # (1, C)
        # One lane->sublane relayout per image (not per tile): store as (1,C,1).
        att_ref[...] = att[:, :, None]


def _apply_kernel(x_ref, att_ref, o_ref):
    # att block is (1, C, 1): C already on sublanes -> plain broadcast multiply.
    o_ref[...] = x_ref[...] * att_ref[...].astype(o_ref.dtype)


# --------------------------------------------------------------------------
# Tiling helpers
# --------------------------------------------------------------------------
def _choose_batch_block(B, tb_max, per_batch_block):
    """Largest divisor of B within tb_max, preferring >= min(B,4) grid steps
    (keeps both v7x TensorCores busy) as long as each block stays >= 1 MiB."""
    tb_max = max(1, min(B, tb_max))
    divisors = [d for d in range(1, B + 1) if B % d == 0 and d <= tb_max]
    tb = max(divisors)
    target_steps = min(B, 4)
    if B // tb < target_steps:
        cands = [d for d in divisors
                 if B // d >= target_steps and d * per_batch_block >= (1 << 20)]
        if cands:
            tb = max(cands)
    return tb


def _pick_hw_tile(hw, budget_bytes, bytes_per_lane):
    """HW tile (multiple of 128) fitting `budget_bytes`, split so the tail
    overshoot is < 128 lanes per tile instead of up to tile-128."""
    tile_max = max(_LANE, (budget_bytes // max(1, bytes_per_lane)) // _LANE * _LANE)
    tile_max = min(tile_max, _round_up(hw, _LANE))
    n = _cdiv(hw, tile_max)
    tile = min(tile_max, _round_up(_cdiv(hw, n), _LANE))
    n_t = _cdiv(hw, tile)
    return tile, n_t


# --------------------------------------------------------------------------
# Wrapper
# --------------------------------------------------------------------------
def channel_attention(x, w1, b1, w2, b2, *,
                      block_budget_bytes=None, vmem_limit_bytes=None):
    """x: (B, C, H, W); w1/b1/w2/b2 in PyTorch Linear (out, in) layout."""
    B, C, H, W = x.shape
    Ch = w1.shape[0]
    HW = H * W
    itemsize = jnp.dtype(x.dtype).itemsize

    # Generation-aware budgets: ~96/44 MiB on 128 MiB parts (v5e/v6e),
    # ~48/22 MiB on v7x (64 MiB physical).
    phys = _vmem_physical_bytes()
    if vmem_limit_bytes is None:
        vmem_limit_bytes = min(phys * 3 // 4, 100 * 1024 * 1024)
    if block_budget_bytes is None:
        block_budget_bytes = min(phys * 11 // 32, 48 * 1024 * 1024)

    # Row-vector form of the shared MLP (weights transposed once, host-side).
    w1t = jnp.asarray(w1).T                                   # (C, Ch)
    w2t = jnp.asarray(w2).T                                   # (Ch, C)
    b1r = jnp.asarray(b1).reshape(1, Ch)
    b2r = jnp.asarray(b2).reshape(1, C)

    x_flat = x.reshape(B, C, HW)
    inv_hw = 1.0 / HW

    hwp = _round_up(HW, _LANE)                                # VMEM footprint per image
    per_batch_block = C * hwp * itemsize
    per_batch_db = 4 * per_batch_block                        # in + out, double-buffered

    def _params(sem):
        return pltpu.CompilerParams(dimension_semantics=sem,
                                    vmem_limit_bytes=vmem_limit_bytes)

    if per_batch_db <= block_budget_bytes:
        # ------------------ fused single-pass path ------------------
        tb = _choose_batch_block(B, block_budget_bytes // per_batch_db,
                                 per_batch_block)
        # TODO(synk): for B == 1 on v7x, split HW across the two TensorCores
        # with a partial-pool combine; grid=(1,) leaves one core idle.
        out_flat = pl.pallas_call(
            functools.partial(_fused_kernel, inv_hw=inv_hw),
            out_shape=jax.ShapeDtypeStruct((B, C, HW), x.dtype),
            grid_spec=pltpu.PrefetchScalarGridSpec(
                num_scalar_prefetch=0,
                grid=(B // tb,),
                in_specs=[
                    pl.BlockSpec((tb, C, HW), lambda i: (i, 0, 0)),
                    pl.BlockSpec((C, Ch), lambda i: (0, 0)),
                    pl.BlockSpec((1, Ch), lambda i: (0, 0)),
                    pl.BlockSpec((Ch, C), lambda i: (0, 0)),
                    pl.BlockSpec((1, C), lambda i: (0, 0)),
                ],
                out_specs=pl.BlockSpec((tb, C, HW), lambda i: (i, 0, 0)),
            ),
            compiler_params=_params(("parallel",)),
        )(x_flat, w1t, b1r, w2t, b2r)
        return out_flat.reshape(B, C, H, W)

    # ------------------ two-phase path (large feature maps) ------------------
    # Pool kernel: only the input block is double-buffered (output is (1,C,1)),
    # so it gets ~2x the hw tile of the apply kernel.
    # NOTE: assumes a (C, 128) slice fits the budget (true for any sane C).
    pool_tile, n_pool = _pick_hw_tile(HW, block_budget_bytes, 2 * C * itemsize)
    apply_tile, n_apply = _pick_hw_tile(HW, block_budget_bytes, 4 * C * itemsize)

    rem_last = HW - (n_pool - 1) * pool_tile
    rem = None if rem_last == pool_tile else rem_last

    # TODO(synk): for B <= 2 on v7x, split the HW reduction across the two
    # TensorCores (grid=(B, 2, n_pool//2) with a partial-reduce combine).
    att = pl.pallas_call(
        functools.partial(_pool_mlp_kernel, inv_hw=inv_hw, rem=rem, n_t=n_pool),
        out_shape=jax.ShapeDtypeStruct((B, C, 1), jnp.float32),
        grid_spec=pltpu.PrefetchScalarGridSpec(
            num_scalar_prefetch=0,
            grid=(B, n_pool),
            in_specs=[
                pl.BlockSpec((1, C, pool_tile), lambda b, t: (b, 0, t)),
                pl.BlockSpec((C, Ch), lambda b, t: (0, 0)),
                pl.BlockSpec((1, Ch), lambda b, t: (0, 0)),
                pl.BlockSpec((Ch, C), lambda b, t: (0, 0)),
                pl.BlockSpec((1, C), lambda b, t: (0, 0)),
            ],
            out_specs=pl.BlockSpec((1, C, 1), lambda b, t: (b, 0, 0)),
            scratch_shapes=[pltpu.VMEM((1, C), jnp.float32),
                            pltpu.VMEM((1, C), jnp.float32)],
        ),
        compiler_params=_params(("parallel", "arbitrary")),
    )(x_flat, w1t, b1r, w2t, b2r)

    out_flat = pl.pallas_call(
        _apply_kernel,
        out_shape=jax.ShapeDtypeStruct((B, C, HW), x.dtype),
        grid_spec=pltpu.PrefetchScalarGridSpec(
            num_scalar_prefetch=0,
            grid=(B, n_apply),
            in_specs=[
                pl.BlockSpec((1, C, apply_tile), lambda b, t: (b, 0, t)),
                pl.BlockSpec((1, C, 1), lambda b, t: (b, 0, 0)),
            ],
            out_specs=pl.BlockSpec((1, C, apply_tile), lambda b, t: (b, 0, t)),
        ),
        compiler_params=_params(("parallel", "parallel")),
    )(x_flat, att)

    return out_flat.reshape(B, C, H, W)


def channel_attention_ref(x, w1, b1, w2, b2):
    """Pure-JAX reference mirroring the PyTorch forward."""
    avg = jnp.mean(x, axis=(2, 3))
    mx = jnp.max(x, axis=(2, 3))

    def mlp(v):
        h = jnp.maximum(v @ w1.T + b1, 0.0)
        return h @ w2.T + b2

    att = jax.nn.sigmoid(mlp(avg) + mlp(mx))[:, :, None, None]
    return x * att


if __name__ == "__main__":
    def make_inputs(key, B, C, H, W, ratio=8):
        Ch = max(1, C // ratio)
        kx, k1, k2, k3, k4 = jax.random.split(key, 5)
        x = jax.random.normal(kx, (B, C, H, W), dtype=jnp.float32)
        w1 = jax.random.normal(k1, (Ch, C), dtype=jnp.float32) * 0.1
        b1 = jax.random.normal(k2, (Ch,), dtype=jnp.float32) * 0.1
        w2 = jax.random.normal(k3, (C, Ch), dtype=jnp.float32) * 0.1
        b2 = jax.random.normal(k4, (C,), dtype=jnp.float32) * 0.1
        return x, w1, b1, w2, b2

    keys = jax.random.split(jax.random.PRNGKey(0), 4)

    # 1) Demo shape: fused path, HW lane-aligned.
    x, w1, b1, w2, b2 = make_inputs(keys[0], 2, 32, 16, 16)
    out = jax.block_until_ready(channel_attention(x, w1, b1, w2, b2))
    ref = channel_attention_ref(x, w1, b1, w2, b2)
    assert out.shape == x.shape
    assert jnp.allclose(out, ref, atol=1e-5, rtol=1e-5), "fused path mismatch"

    # 2) Non-128-multiple HW (15x15): fused path with full-extent last dim,
    #    no host-side pad, no in-kernel masks.
    x, w1, b1, w2, b2 = make_inputs(keys[1], 2, 32, 15, 15)
    out = jax.block_until_ready(channel_attention(x, w1, b1, w2, b2))
    ref = channel_attention_ref(x, w1, b1, w2, b2)
    assert jnp.allclose(out, ref, atol=1e-5, rtol=1e-5), "padded-HW fused mismatch"

    # 3) Two-phase path forced via a tiny block budget: partial last tile in
    #    both kernels (masked sum/max on last pool tile, dropped OOB writes).
    x, w1, b1, w2, b2 = make_inputs(keys[2], 2, 32, 31, 31)
    out = jax.block_until_ready(
        channel_attention(x, w1, b1, w2, b2, block_budget_bytes=64 * 1024))
    ref = channel_attention_ref(x, w1, b1, w2, b2)
    assert jnp.allclose(out, ref, atol=1e-5, rtol=1e-5), "two-phase mismatch"

    # 4) Two-phase path with exactly dividing tiles (no masking branch).
    x, w1, b1, w2, b2 = make_inputs(keys[3], 2, 32, 32, 32)
    out = jax.block_until_ready(
        channel_attention(x, w1, b1, w2, b2, block_budget_bytes=64 * 1024))
    ref = channel_attention_ref(x, w1, b1, w2, b2)
    assert jnp.allclose(out, ref, atol=1e-5, rtol=1e-5), "two-phase (aligned) mismatch"

    print("KERNEL_OK")
</pallas_src>

<mosaic_0001>
module attributes {stable_mosaic.version = 11 : i64} {
  func.func @_fused_kernel(%arg0: i32, %arg1: memref<2x32x256xf32, #tpu.memory_space<vmem>>, %arg2: memref<32x4xf32, #tpu.memory_space<vmem>>, %arg3: memref<1x4xf32, #tpu.memory_space<vmem>>, %arg4: memref<4x32xf32, #tpu.memory_space<vmem>>, %arg5: memref<1x32xf32, #tpu.memory_space<vmem>>, %arg6: memref<2x32x256xf32, #tpu.memory_space<vmem>>) attributes {dimension_semantics = [#tpu.dimension_semantics<parallel>], iteration_bounds = array<i64: 1>, scalar_prefetch = 0 : i64, scratch_operands = 0 : i64, tpu.core_type = #tpu.core_type<tc>, window_params = [{transform_indices = @transform_0, window_bounds = array<i64: 2, 32, 256>}, {pipeline_mode = #tpu.pipeline_mode<synchronous>, transform_indices = @transform_1, window_bounds = array<i64: 32, 4>}, {pipeline_mode = #tpu.pipeline_mode<synchronous>, transform_indices = @transform_2, window_bounds = array<i64: 1, 4>}, {pipeline_mode = #tpu.pipeline_mode<synchronous>, transform_indices = @transform_3, window_bounds = array<i64: 4, 32>}, {pipeline_mode = #tpu.pipeline_mode<synchronous>, transform_indices = @transform_4, window_bounds = array<i64: 1, 32>}, {transform_indices = @transform_5, window_bounds = array<i64: 2, 32, 256>}]} {
    %c0 = arith.constant 0 : index
    %c0_0 = arith.constant 0 : index
    %c0_1 = arith.constant 0 : index
    %0 = vector.load %arg1[%c0, %c0_0, %c0_1] : memref<2x32x256xf32, #tpu.memory_space<vmem>>, vector<2x32x256xf32>
    %cst = arith.constant dense<0.000000e+00> : vector<2x32xf32>
    %1 = vector.multi_reduction <add>, %0, %cst [2] : vector<2x32x256xf32> to vector<2x32xf32>
    %cst_2 = arith.constant 3.906250e-03 : f32
    %2 = vector.broadcast %cst_2 : f32 to vector<2x32xf32>
    %3 = arith.mulf %1, %2 : vector<2x32xf32>
    %cst_3 = arith.constant dense<0xFF800000> : vector<2x32xf32>
    %4 = vector.multi_reduction <maximumf>, %0, %cst_3 [2] : vector<2x32x256xf32> to vector<2x32xf32>
    %5 = tpu.concatenate %3, %4 in 0 : vector<2x32xf32>, vector<2x32xf32> -> vector<4x32xf32>
    %c0_4 = arith.constant 0 : index
    %c0_5 = arith.constant 0 : index
    %6 = vector.load %arg2[%c0_4, %c0_5] : memref<32x4xf32, #tpu.memory_space<vmem>>, vector<32x4xf32>
    %cst_6 = arith.constant dense<0.000000e+00> : vector<4x4xf32>
    %7 = tpu.matmul %5, %6, %cst_6 {dimension_numbers = #tpu.dot_dimension_numbers<[1], [0], [0], [1], [0, 0, 1, 1], [], []>} : vector<4x32xf32>, vector<32x4xf32>, vector<4x4xf32> -> vector<4x4xf32>
    %c0_7 = arith.constant 0 : index
    %c0_8 = arith.constant 0 : index
    %8 = vector.load %arg3[%c0_7, %c0_8] : memref<1x4xf32, #tpu.memory_space<vmem>>, vector<1x4xf32>
    %9 = vector.broadcast %8 : vector<1x4xf32> to vector<4x4xf32>
    %10 = arith.addf %7, %9 : vector<4x4xf32>
    %cst_9 = arith.constant 0.000000e+00 : f32
    %11 = vector.broadcast %cst_9 : f32 to vector<4x4xf32>
    %12 = arith.maximumf %10, %11 : vector<4x4xf32>
    %c0_10 = arith.constant 0 : index
    %c0_11 = arith.constant 0 : index
    %13 = vector.load %arg4[%c0_10, %c0_11] : memref<4x32xf32, #tpu.memory_space<vmem>>, vector<4x32xf32>
    %cst_12 = arith.constant dense<0.000000e+00> : vector<4x32xf32>
    %14 = tpu.matmul %12, %13, %cst_12 {dimension_numbers = #tpu.dot_dimension_numbers<[1], [0], [0], [1], [0, 0, 1, 1], [], []>} : vector<4x4xf32>, vector<4x32xf32>, vector<4x32xf32> -> vector<4x32xf32>
    %c0_13 = arith.constant 0 : index
    %c0_14 = arith.constant 0 : index
    %15 = vector.load %arg5[%c0_13, %c0_14] : memref<1x32xf32, #tpu.memory_space<vmem>>, vector<1x32xf32>
    %16 = vector.broadcast %15 : vector<1x32xf32> to vector<4x32xf32>
    %17 = arith.addf %14, %16 : vector<4x32xf32>
    %18 = vector.extract_strided_slice %17 {offsets = [0, 0], sizes = [2, 32], strides = [1, 1]} : vector<4x32xf32> to vector<2x32xf32>
    %19 = vector.extract_strided_slice %17 {offsets = [2, 0], sizes = [2, 32], strides = [1, 1]} : vector<4x32xf32> to vector<2x32xf32>
    %20 = arith.addf %18, %19 : vector<2x32xf32>
    %21 = arith.negf %20 : vector<2x32xf32>
    %22 = math.exp %21 : vector<2x32xf32>
    %cst_15 = arith.constant 1.000000e+00 : f32
    %23 = vector.broadcast %cst_15 : f32 to vector<2x32xf32>
    %24 = arith.addf %23, %22 : vector<2x32xf32>
    %25 = arith.divf %23, %24 : vector<2x32xf32>
    %26 = vector.shape_cast %25 : vector<2x32xf32> to vector<2x32x1xf32>
    %27 = vector.broadcast %26 : vector<2x32x1xf32> to vector<2x32x256xf32>
    %28 = arith.mulf %0, %27 : vector<2x32x256xf32>
    %c0_16 = arith.constant 0 : index
    %c0_17 = arith.constant 0 : index
    %c0_18 = arith.constant 0 : index
    %29 = vector.load %arg6[%c0_16, %c0_17, %c0_18] : memref<2x32x256xf32, #tpu.memory_space<vmem>>, vector<2x32x256xf32>
    tpu.vector_store %arg6[%c0_16, %c0_17, %c0_18], %28 {strides = array<i32>} : memref<2x32x256xf32, #tpu.memory_space<vmem>>, vector<2x32x256xf32>,
    return
  }
  func.func @transform_0(%arg0: i32) -> (i32, i32, i32) {
    %c0_i32 = arith.constant 0 : i32
    %c0_i32_0 = arith.constant 0 : i32
    %c0_i32_1 = arith.constant 0 : i32
    return %arg0, %c0_i32, %c0_i32_0 : i32, i32, i32
  }
  func.func @transform_1(%arg0: i32) -> (i32, i32) {
    %c0_i32 = arith.constant 0 : i32
    %c0_i32_0 = arith.constant 0 : i32
    %c0_i32_1 = arith.constant 0 : i32
    return %c0_i32, %c0_i32_0 : i32, i32
  }
  func.func @transform_2(%arg0: i32) -> (i32, i32) {
    %c0_i32 = arith.constant 0 : i32
    %c0_i32_0 = arith.constant 0 : i32
    %c0_i32_1 = arith.constant 0 : i32
    return %c0_i32, %c0_i32_0 : i32, i32
  }
  func.func @transform_3(%arg0: i32) -> (i32, i32) {
    %c0_i32 = arith.constant 0 : i32
    %c0_i32_0 = arith.constant 0 : i32
    %c0_i32_1 = arith.constant 0 : i32
    return %c0_i32, %c0_i32_0 : i32, i32
  }
  func.func @transform_4(%arg0: i32) -> (i32, i32) {
    %c0_i32 = arith.constant 0 : i32
    %c0_i32_0 = arith.constant 0 : i32
    %c0_i32_1 = arith.constant 0 : i32
    return %c0_i32, %c0_i32_0 : i32, i32
  }
  func.func @transform_5(%arg0: i32) -> (i32, i32, i32) {
    %c0_i32 = arith.constant 0 : i32
    %c0_i32_0 = arith.constant 0 : i32
    %c0_i32_1 = arith.constant 0 : i32
    return %arg0, %c0_i32, %c0_i32_0 : i32, i32, i32
  }
}

</mosaic_0001>

<bundles_post_ra>
// kernel: tpu_custom_call.1
= control target key start
LH: loop header
LB: loop body
LE: loop exit
PB: predicated region body
PF: predicated region fallthrough
CT: control target
= control target key end

     0   :  { %10 = vsyncpa [#allocation3], 0  ;;  %s738_s0 = inlined_call_operand.hbm [shape: f32[2,32,256], index: 0, kind: input, shape index: {}]   ;;  %s739_s1 = inlined_call_operand.vmem [shape: f32[32,4], index: 1, kind: input, shape index: {}]   ;;  %s740_s2 = inlined_call_operand.vmem [shape: f32[1,4], index: 2, kind: input, shape index: {}]   ;;  %s741_s3 = inlined_call_operand.vmem [shape: f32[4,32], index: 3, kind: input, shape index: {}]   ;;  %s742_s4 = inlined_call_operand.vmem [shape: f32[1,32], index: 4, kind: input, shape index: {}]   ;;  %s743_s5 = inlined_call_operand.hbm [shape: f32[2,32,256], index: 5, kind: output, shape index: {}]  }
   0x1   :  { %11 = vsyncpa [#allocation4], 0  ;;  %s567_s18 = smov [#allocation2]  }
   0x2   :  { %s17_s19 = sshll.u32 %s567_s18, 4  ;;  %s18_s19 = int_to_ptr.vmem [resolvable:$true] %s17_s19 }
   0x3   :  { %s531_s20 = scalar_lea.vmem %s18_s19, 2048  ;;  %p536_p1 = scmp.lt.s32.totalorder %s18_s19, %s18_s19 }
   0x4   :  { %p532_p0 = scmp.ne.s32.totalorder %s18_s19, %s531_s20  ;;  %p537_p2 = scmp.lt.s32.totalorder %s531_s20, %s531_s20 }
   0x6   :  { %p538_p3 = por %p537_p2, %p536_p1 }
   0x8   :  { %p539_p4 = pnand %p538_p3, %p532_p0 }
   0xa   :  { %542 = shalt.err (!%p539_p4)
}
   0xb   :  { %s568_s21 = smov 256   ;;  %s569_s22 = smov 16  }
   0xc   :  { %23 = dma.hbm_to_vmem [thread:$0]  %s738_s0, 2048, %s18_s19, [#allocation3], %s568_s21, %s568_s21, %s569_s22  }
   0xd   :  { %563 = dma.done.wait [#allocation3], 2048  }
   0xe   :  { %564 = vsyncadd [#allocation3], 4294965248  ;;  %v609_v0 = vld [vmem:[#allocation2 + $0x40] sm:$0xff]  ;;  %v611_v1 = vld [vmem:[#allocation2 + $0x48] sm:$0xff]  ;;  %v570_v32 = vmov 0.0   ;;  %vm571_vm0 = vmmov 0   ;;  %v115_v42 = vlaneseq }
   0xf   :  { %v613_v2 = vld [vmem:[#allocation2] sm:$0xff]  ;;  %v63_v3 = vadd.f32 %v611_v1, %v609_v0  ;;  %v617_v4 = vld [vmem:[#allocation2 + $0x8] sm:$0xff]  ;;  %v619_v5 = vld [vmem:[#allocation2 + $0x50] sm:$0xff]  ;;  %v95_v27 = vmax.f32 %v609_v0, %v611_v1  ;;  %497 = vmatprep.subr.mxu0 %v570_v32  ;;  %508 = vmatprep.subr.mxu1 %v570_v32  ;;  %vm126_vm1 = vcmask 130112   ;;  %vm133_vm2 = vcmask 195712  }
  0x10   :  { %v621_v6 = vld [vmem:[#allocation2 + $0x58] sm:$0xff]  ;;  %v51_v7 = vadd.f32 %v617_v4, %v613_v2  ;;  %v625_v8 = vld [vmem:[#allocation2 + $0x10] sm:$0xff]  ;;  %v633_v12 = vld [vmem:[#allocation2 + $0x60] sm:$0xff]  ;;  %v83_v25 = vmax.f32 %v613_v2, %v617_v4  ;;  %505 = vmatprep.mubr.msk.f32.mxu0 %vm571_vm0, %v570_v32  ;;  %510 = vmatprep.mubr.msk.f32.mxu1 %vm571_vm0, %v570_v32  ;;  %v116_v45 = vand.u32 127, %v115_v42  ;;  %v685_v47 = vshrl.u32 %v115_v42, 7 }
  0x11   :  { %v627_v9 = vld [vmem:[#allocation2 + $0x18] sm:$0xff]  ;;  %64 = vadd.xlane.f32.xlu1 %v63_v3  ;;  %v66_v10 = vadd.f32 %v621_v6, %v619_v5  ;;  %v635_v13 = vld [vmem:[#allocation2 + $0x68] sm:$0xff]  ;;  %v637_v14 = vld [vmem:[#allocation2 + $0x20] sm:$0xff]  ;;  %v98_v26 = vmax.f32 %v619_v5, %v621_v6  ;;  %vm140_vm3 = vcmask 261312   ;;  %vm161_vm4 = vcmask 1041409  }
  0x12   :  { %52 = vadd.xlane.f32.xlu0 %v51_v7  ;;  %v54_v11 = vadd.f32 %v627_v9, %v625_v8  ;;  %v639_v15 = vld [vmem:[#allocation2 + $0x28] sm:$0xff]  ;;  %v69_v16 = vadd.f32 %v635_v13, %v633_v12  ;;  %v645_v18 = vld [vmem:[#allocation2 + $0x70] sm:$0xff]  ;;  %v647_v19 = vld [vmem:[#allocation2 + $0x78] sm:$0xff]  ;;  %v86_v24 = vmax.f32 %v625_v8, %v627_v9  ;;  %v101_v28 = vmax.f32 %v633_v12, %v635_v13 }
  0x13   :  { %v57_v17 = vadd.f32 %v639_v15, %v637_v14  ;;  %v649_v20 = vld [vmem:[#allocation2 + $0x30] sm:$0xff]  ;;  %v651_v21 = vld [vmem:[#allocation2 + $0x38] sm:$0xff]  ;;  %v72_v22 = vadd.f32 %v647_v19, %v645_v18  ;;  %v89_v29 = vmax.f32 %v637_v14, %v639_v15  ;;  %v104_v30 = vmax.f32 %v645_v18, %v647_v19  ;;  %v216_v35 = vld [vmem:[%s739_s1 + $0x8] sm:$0xff] }
  0x14   :  { %v60_v23 = vadd.f32 %v651_v21, %v649_v20  ;;  %v92_v31 = vmax.f32 %v649_v20, %v651_v21  ;;  %v218_v33 = vld [vmem:[%s739_s1 + $0x18] sm:$0xff]  ;;  %v217_v34 = vld [vmem:[%s739_s1 + $0x10] sm:$0xff]  ;;  %v215_v36 = vld [vmem:[%s739_s1] sm:$0xff]  ;;  %v121_v48 = vadd.s32 4294967288, %v116_v45  ;;  %v128_v49 = vadd.s32 4294967280, %v116_v45 }
  0x15   :  { %67 = vadd.xlane.f32.xlu1 %v66_v10  ;;  %498 = vmatpush3.msra.mxu0 %v218_v33  ;;  %v135_v51 = vadd.s32 4294967272, %v116_v45  ;;  %v119_v53 = vsub.s32 %v116_v45, %v685_v47  ;;  %vm210_vm5 = vcmask 1043459   ;;  %vm213_vm6 = vcmask 1041408  }
  0x16   :  { %55 = vadd.xlane.f32.xlu0 %v54_v11  ;;  %499 = vmatprep.subr.mxu0 %v570_v32  ;;  %v124_v54 = vsub.s32 %v121_v48, %v685_v47  ;;  %v131_v56 = vsub.s32 %v128_v49, %v685_v47  ;;  %vm226_vm7 = vcmask 261120   ;;  %vm313_vm8 = vcmask 1043456  }
  0x17   :  { %500 = vmatpush3.msra.mxu0 %v217_v34  ;;  %v138_v63 = vsub.s32 %v135_v51, %v685_v47  ;;  %vm309_vm9 = vcmask 31744  }
  0x18   :  { %501 = vmatprep.subr.mxu0 %v570_v32 }
  0x19   :  { %70 = vadd.xlane.f32.xlu1 %v69_v16  ;;  %502 = vmatpush3.msra.mxu0 %v216_v35 }
  0x1a   :  { %58 = vadd.xlane.f32.xlu0 %v57_v17  ;;  %503 = vmatprep.subr.mxu0 %v570_v32 }
  0x1b   :  { %504 = vmatpush3.msra.mxu0 %v215_v36 }
  0x1d   :  { %73 = vadd.xlane.f32.xlu1 %v72_v22 }
  0x1e   :  { %61 = vadd.xlane.f32.xlu0 %v60_v23 }
  0x21   :  { %87 = vmax.xlane.f32.xlu1 %v86_v24 }
  0x22   :  { %84 = vmax.xlane.f32.xlu0 %v83_v25 }
  0x25   :  { %99 = vmax.xlane.f32.xlu1 %v98_v26 }
  0x26   :  { %96 = vmax.xlane.f32.xlu0 %v95_v27 }
  0x29   :  { %102 = vmax.xlane.f32.xlu1 %v101_v28 }
  0x2a   :  { %90 = vmax.xlane.f32.xlu0 %v89_v29 }
  0x2d   :  { %105 = vmax.xlane.f32.xlu1 %v104_v30 }
  0x2e   :  { %93 = vmax.xlane.f32.xlu0 %v92_v31 }
  0x9a   :  { %v65_v37 = vpop.xlane.xlu1 %64 }
  0x9b   :  { %v53_v38 = vpop.xlane.xlu0 %52  ;;  %v79_v57 = vmul.f32 0.00390625, %v65_v37 }
  0x9c   :  { %v75_v58 = vmul.f32 0.00390625, %v53_v38 }
  0x9d   :  { %v145_v16 = vrot.slane %v79_v57, %v119_v53 }
  0x9e   :  { %v68_v39 = vpop.xlane.xlu1 %67  ;;  %v120_v17 = vrot.slane %v75_v58, %v119_v53 }
  0x9f   :  { %v56_v40 = vpop.xlane.xlu0 %55  ;;  %v80_v55 = vmul.f32 0.00390625, %v68_v39 }
  0xa0   :  { %v76_v59 = vmul.f32 0.00390625, %v56_v40 }
  0xa1   :  { %v149_v11 = vrot.slane %v80_v55, %v124_v54  ;;  %v301_v55 = vld [vmem:[%s741_s3] sm:$0xf] }
  0xa2   :  { %v71_v41 = vpop.xlane.xlu1 %70  ;;  %v125_v22 = vrot.slane %v76_v59, %v124_v54  ;;  %509 = vmatpush3.msk.msra.mxu1 %vm313_vm8, %v301_v55 }
  0xa3   :  { %v59_v43 = vpop.xlane.xlu0 %58  ;;  %v81_v60 = vmul.f32 0.00390625, %v71_v41  ;;  %v150_v34 = vsel %vm126_vm1, %v149_v11, %v145_v16 }
  0xa4   :  { %v77_v62 = vmul.f32 0.00390625, %v59_v43  ;;  %v127_v36 = vsel %vm126_vm1, %v125_v22, %v120_v17  ;;  %v399_v22 = vsub.s32 0, %v685_v47 }
  0xa5   :  { %v154_v23 = vrot.slane %v81_v60, %v131_v56 }
  0xa6   :  { %v74_v44 = vpop.xlane.xlu1 %73  ;;  %v132_v25 = vrot.slane %v77_v62, %v131_v56 }
  0xa7   :  { %v62_v46 = vpop.xlane.xlu0 %61  ;;  %v82_v3 = vmul.f32 0.00390625, %v74_v44  ;;  %v155_v37 = vsel %vm133_vm2, %v154_v23, %v150_v34 }
  0xa8   :  { %v78_v10 = vmul.f32 0.00390625, %v62_v46  ;;  %v134_v39 = vsel %vm133_vm2, %v132_v25, %v127_v36  ;;  %v418_v25 = vsub.s32 1, %v685_v47 }
  0xa9   :  { %v159_v26 = vrot.slane %v82_v3, %v138_v63 }
  0xaa   :  { %v88_v50 = vpop.xlane.xlu1 %87  ;;  %v139_v30 = vrot.slane %v78_v10, %v138_v63 }
  0xab   :  { %v85_v52 = vpop.xlane.xlu0 %84  ;;  %v179_v31 = vrot.slane %v88_v50, %v124_v54  ;;  %v160_v40 = vsel %vm140_vm3, %v159_v26, %v155_v37 }
  0xac   :  { %v175_v32 = vrot.slane %v85_v52, %v119_v53  ;;  %v141_v44 = vsel %vm140_vm3, %v139_v30, %v134_v39 }
  0xad   :  { %v162_v52 = vsel %vm161_vm4, %v160_v40, %v141_v44 }
  0xae   :  { %v100_v61 = vpop.xlane.xlu1 %99  ;;  %v180_v45 = vsel %vm126_vm1, %v179_v31, %v175_v32 }
  0xaf   :  { %v97_v7 = vpop.xlane.xlu0 %96  ;;  %v198_v27 = vrot.slane %v100_v61, %v124_v54  ;;  %v486_v61 = vld [vmem:[%s742_s4] ss:$0 sm:$0xff] }
  0xb0   :  { %v194_v28 = vrot.slane %v97_v7, %v119_v53 }
  0xb2   :  { %v103_v24 = vpop.xlane.xlu1 %102  ;;  %v199_v41 = vsel %vm126_vm1, %v198_v27, %v194_v28 }
  0xb3   :  { %v91_v29 = vpop.xlane.xlu0 %90  ;;  %v203_v33 = vrot.slane %v103_v24, %v131_v56 }
  0xb4   :  { %v184_v35 = vrot.slane %v91_v29, %v131_v56  ;;  %v484_v56 = vld [vmem:[%s740_s2] ss:$0 sm:$0xff]  ;;  %s572_s2 = smov [#allocation5]  }
  0xb5   :  { %v204_v46 = vsel %vm133_vm2, %v203_v33, %v199_v41  ;;  %s472_s3 = sshll.u32 %s572_s2, 4  ;;  %s473_s3 = int_to_ptr.vmem [resolvable:$true] %s472_s3 }
  0xb6   :  { %v106_v38 = vpop.xlane.xlu1 %105  ;;  %v185_v49 = vsel %vm133_vm2, %v184_v35, %v180_v45  ;;  %s543_s4 = scalar_lea.vmem %s473_s3, 2048  ;;  %p548_p6 = scmp.lt.s32.totalorder %s473_s3, %s473_s3 }
  0xb7   :  { %v208_v42 = vrot.slane %v106_v38, %v138_v63  ;;  %v94_v43 = vpop.xlane.xlu0 %93  ;;  %p544_p5 = scmp.ne.s32.totalorder %s473_s3, %s543_s4  ;;  %p549_p7 = scmp.lt.s32.totalorder %s543_s4, %s543_s4 }
  0xb8   :  { %v189_v48 = vrot.slane %v94_v43, %v138_v63 }
  0xb9   :  { %v209_v50 = vsel %vm140_vm3, %v208_v42, %v204_v46  ;;  %p550_p8 = por %p549_p7, %p548_p6 }
  0xba   :  { %v190_v51 = vsel %vm140_vm3, %v189_v48, %v185_v49 }
  0xbb   :  { %v211_v53 = vsel %vm210_vm5, %v209_v50, %v190_v51  ;;  %p551_p9 = pnand %p550_p8, %p544_p5 }
  0xbc   :  { %v214_v54 = vsel %vm213_vm6, %v162_v52, %v211_v53 }
  0xbd   :  { %506 = vmatmul.mubr.msk.f32.vlgmr.msra.gmra.mxu0 %vm226_vm7, %v214_v54 }
 0x17d   :  { %v296_v57 = vpop.f32.mrf.mxu0 }
 0x17e   :  { %v297_v58 = vadd.f32 %v484_v56, %v296_v57 }
 0x17f   :  { %v507_v59 = vpop.f32.mrf.mxu0 }
 0x180   :  { %v300_v60 = vmax.f32 %v297_v58, 0.0 }
 0x182   :  { %511 = vmatmul.mubr.msk.f32.vlgmr.msra.gmra.mxu1 %vm309_vm9, %v300_v60 }
 0x242   :  { %v383_v62 = vpop.f32.mrf.mxu1 }
 0x243   :  { %v384_v63 = vadd.f32 %v486_v61, %v383_v62 }
 0x244   :  { %v512_v3 = vpop.f32.mrf.mxu1 }
 0x245   :  { %v388_v7 = vrot.slane %v384_v63, 2 }
 0x247   :  { %v390_v10 = vadd.f32 %v388_v7, %v384_v63 }
 0x249   :  { %v489_v11 = vmul.f32 -1.442695, %v390_v10 }
 0x24b   :  { %519 = vpow2.f32 %v489_v11 }
 0x258   :  { %v520_v16 = vpop.eup %519 }
 0x259   :  { %v394_v17 = vadd.f32 1.0, %v520_v16 }
 0x25b   :  { %521 = vrcp.f32 %v394_v17 }
 0x268   :  { %v522_v23 = vpop.eup %521 }
 0x269   :  { %v400_v24 = vrot.slane %v522_v23, %v399_v22  ;;  %v419_v26 = vrot.slane %v522_v23, %v418_v25 }
 0x26b   :  { %406 = vbcast.lane.b32.xlu1 %v400_v24, 264  ;;  %402 = vbcast.lane.b32.xlu0 %v400_v24, 256 }
 0x26f   :  { %410 = vbcast.lane.b32.xlu1 %v400_v24, 272  ;;  %421 = vbcast.lane.b32.xlu0 %v419_v26, 256 }
 0x273   :  { %414 = vbcast.lane.b32.xlu1 %v400_v24, 280  ;;  %429 = vbcast.lane.b32.xlu0 %v419_v26, 272 }
 0x277   :  { %425 = vbcast.lane.b32.xlu1 %v419_v26, 264 }
 0x27b   :  { %433 = vbcast.lane.b32.xlu1 %v419_v26, 280 }
 0x2dd   :  { %v407_v27 = vpop.permute.xlu1 %406  ;;  %v403_v28 = vpop.permute.xlu0 %402 }
 0x2de   :  { %v437_v29 = vmul.f32 %v407_v27, %v625_v8  ;;  %v438_v30 = vmul.f32 %v407_v27, %v627_v9  ;;  %v435_v31 = vmul.f32 %v403_v28, %v613_v2  ;;  %v436_v32 = vmul.f32 %v403_v28, %v617_v4 }
 0x2e0   :  { %453 = vst [vmem:[#allocation5 + $0x10] sm:$0xff] %v437_v29  ;;  %454 = vst [vmem:[#allocation5 + $0x18] sm:$0xff] %v438_v30 }
 0x2e1   :  { %451 = vst [vmem:[#allocation5] sm:$0xff] %v435_v31  ;;  %452 = vst [vmem:[#allocation5 + $0x8] sm:$0xff] %v436_v32  ;;  %v411_v47 = vpop.permute.xlu1 %410  ;;  %v422_v33 = vpop.permute.xlu0 %421 }
 0x2e2   :  { %v439_v34 = vmul.f32 %v411_v47, %v637_v14  ;;  %v440_v35 = vmul.f32 %v411_v47, %v639_v15  ;;  %v443_v36 = vmul.f32 %v422_v33, %v609_v0  ;;  %v444_v8 = vmul.f32 %v422_v33, %v611_v1 }
 0x2e4   :  { %455 = vst [vmem:[#allocation5 + $0x20] sm:$0xff] %v439_v34  ;;  %456 = vst [vmem:[#allocation5 + $0x28] sm:$0xff] %v440_v35 }
 0x2e5   :  { %459 = vst [vmem:[#allocation5 + $0x40] sm:$0xff] %v443_v36  ;;  %460 = vst [vmem:[#allocation5 + $0x48] sm:$0xff] %v444_v8  ;;  %v415_v2 = vpop.permute.xlu1 %414  ;;  %v430_v4 = vpop.permute.xlu0 %429 }
 0x2e6   :  { %v441_v9 = vmul.f32 %v415_v2, %v649_v20  ;;  %v442_v37 = vmul.f32 %v415_v2, %v651_v21  ;;  %v447_v38 = vmul.f32 %v430_v4, %v633_v12  ;;  %v448_v14 = vmul.f32 %v430_v4, %v635_v13 }
 0x2e8   :  { %457 = vst [vmem:[#allocation5 + $0x30] sm:$0xff] %v441_v9  ;;  %458 = vst [vmem:[#allocation5 + $0x38] sm:$0xff] %v442_v37 }
 0x2e9   :  { %463 = vst [vmem:[#allocation5 + $0x60] sm:$0xff] %v447_v38  ;;  %464 = vst [vmem:[#allocation5 + $0x68] sm:$0xff] %v448_v14  ;;  %v426_v0 = vpop.permute.xlu1 %425 }
 0x2ea   :  { %v445_v1 = vmul.f32 %v426_v0, %v619_v5  ;;  %v446_v15 = vmul.f32 %v426_v0, %v621_v6 }
 0x2ec   :  { %461 = vst [vmem:[#allocation5 + $0x50] sm:$0xff] %v445_v1  ;;  %462 = vst [vmem:[#allocation5 + $0x58] sm:$0xff] %v446_v15 }
 0x2ed   :  { %v434_v20 = vpop.permute.xlu1 %433 }
 0x2ee   :  { %v449_v21 = vmul.f32 %v434_v20, %v645_v18  ;;  %v450_v12 = vmul.f32 %v434_v20, %v647_v19 }
 0x2f0   :  { %465 = vst [vmem:[#allocation5 + $0x70] sm:$0xff] %v449_v21  ;;  %466 = vst [vmem:[#allocation5 + $0x78] sm:$0xff] %v450_v12 }
 0x2f1   :  { %554 = shalt.err (!%p551_p9)
}
 0x2f2   :  { %478 = dma.vmem_to_hbm [thread:$0]  %s473_s3, 2048, %s743_s5, [#allocation4], %s568_s21, %s568_s21, %s569_s22  }
 0x2f3   :  { %565 = dma.done.wait [#allocation4], 2048  }
 0x2f4   :  { %566 = vsyncadd [#allocation4], 4294965248 }
 0x2f5   :  { %482 = vsyncpa [#allocation3], 1 }
 0x2f6   :  { %483 = vsyncpa [#allocation4], 1 }

</bundles_post_ra>
